<compile_context>
chip_gen: v6e
topology: v6e:2x2x1
jax: 0.10.0
libtpu: 0.0.40
codegen_flags: <defaults>
</compile_context>

<pallas_src>
import math

import jax
import jax.numpy as jnp
from jax.experimental import pallas as pl
from jax.experimental.pallas import tpu as pltpu

LANES = 128
_TILE_ROWS_MAX = 1024   # packed 128-lane rows per grid step (512 KiB in f32)
_TILE_M_MAX = 8192      # fallback (unpacked) rows per grid step


def _round_up(x, m):
    return (x + m - 1) // m * m


def _ar_packed_kernel(x_ref, w_ref, b_ref, o_ref):
    # x_ref: (TILE_R, 128)  packed rows, each holding G = 128 // W windows
    # w_ref: (128, G)       block-diagonal weight matrix, VMEM-resident across the grid
    # b_ref: (1,) in SMEM   scalar bias
    # o_ref: (TILE_R, G)
    acc = jnp.dot(x_ref[...], w_ref[...], preferred_element_type=jnp.float32)
    o_ref[...] = (acc + b_ref[0]).astype(o_ref.dtype)


def _ar_rows_kernel(x_ref, w_ref, b_ref, o_ref):
    # Fallback (window does not divide 128): VPU multiply + lane reduce.
    # x_ref: (TILE_M, W), w_ref: (1, W), b_ref: (1,) SMEM, o_ref: (TILE_M, 1)
    prod = x_ref[...].astype(jnp.float32) * w_ref[...].astype(jnp.float32)
    o_ref[...] = (jnp.sum(prod, axis=-1, keepdims=True) + b_ref[0]).astype(o_ref.dtype)


def _ar_forward_packed(x2d, w_vec, bias, out_dtype):
    m, window = x2d.shape
    g = LANES // window                      # windows per packed 128-lane row

    rows = max(-(-m // g), 1)                # packed rows needed
    rows = _round_up(rows, 8)                # sublane alignment
    tile_r = min(_TILE_ROWS_MAX, rows)
    rows = _round_up(rows, tile_r)           # whole number of grid tiles
    m_padded = rows * g

    x_pad = jnp.pad(x2d, ((0, m_padded - m), (0, 0)))
    x_packed = x_pad.reshape(rows, LANES)    # contiguous, free reshape

    # Block-diagonal weight: w_mat[gr*W + wi, gc] = w_vec[wi] if gr == gc else 0,
    # so (x_packed @ w_mat)[r, gc] = <window gc of packed row r, w>.
    eye_g = jnp.eye(g, dtype=x2d.dtype)
    w_mat = (eye_g[:, None, :] * w_vec.astype(x2d.dtype)[None, :, None]).reshape(LANES, g)

    b1 = bias.reshape(1).astype(jnp.float32)

    num_tiles = rows // tile_r
    cost = pl.CostEstimate(
        flops=2 * rows * LANES * g,
        transcendentals=0,
        bytes_accessed=int(
            x_packed.size * x_packed.dtype.itemsize
            + w_mat.size * w_mat.dtype.itemsize
            + rows * g * jnp.dtype(out_dtype).itemsize
        ),
    )

    out_packed = pl.pallas_call(
        _ar_packed_kernel,
        out_shape=jax.ShapeDtypeStruct((rows, g), out_dtype),
        grid=(num_tiles,),
        in_specs=[
            pl.BlockSpec((tile_r, LANES), lambda i: (i, 0)),
            pl.BlockSpec((LANES, g), lambda i: (0, 0)),          # resident weight
            pl.BlockSpec(memory_space=pltpu.MemorySpace.SMEM),   # scalar bias
        ],
        out_specs=pl.BlockSpec((tile_r, g), lambda i: (i, 0)),
        compiler_params=pltpu.CompilerParams(
            dimension_semantics=("parallel",),
        ),
        cost_estimate=cost,
    )(x_packed, w_mat, b1)

    return out_packed.reshape(rows * g)[:m]


def _ar_forward_rows(x2d, w_vec, bias, out_dtype):
    m, window = x2d.shape
    tile_m = min(_TILE_M_MAX, _round_up(max(m, 1), 8))
    m_pad = _round_up(max(m, 1), tile_m)
    x_pad = jnp.pad(x2d, ((0, m_pad - m), (0, 0)))
    w_row = w_vec.reshape(1, window)
    b1 = bias.reshape(1).astype(jnp.float32)

    out = pl.pallas_call(
        _ar_rows_kernel,
        out_shape=jax.ShapeDtypeStruct((m_pad, 1), out_dtype),
        grid=(m_pad // tile_m,),
        in_specs=[
            pl.BlockSpec((tile_m, window), lambda i: (i, 0)),
            pl.BlockSpec((1, window), lambda i: (0, 0)),
            pl.BlockSpec(memory_space=pltpu.MemorySpace.SMEM),
        ],
        out_specs=pl.BlockSpec((tile_m, 1), lambda i: (i, 0)),
        compiler_params=pltpu.CompilerParams(
            dimension_semantics=("parallel",),
        ),
    )(x_pad, w_row, b1)

    return out.reshape(m_pad)[:m]


@jax.jit
def ar_forward(x, weight, bias):
    """AR forward: y = x @ weight.T + bias with weight (1, window), bias (1,)."""
    window = x.shape[-1]
    lead_shape = x.shape[:-1]
    m = math.prod(lead_shape) if lead_shape else 1

    x2d = x.reshape(m, window)
    w_vec = weight.reshape(window)

    if window <= LANES and LANES % window == 0:
        out_flat = _ar_forward_packed(x2d, w_vec, bias, x.dtype)
    else:
        out_flat = _ar_forward_rows(x2d, w_vec, bias, x.dtype)

    return out_flat.reshape(*lead_shape, 1)


def init_ar_params(window, key):
    """Deterministic init mirroring nn.Linear(window, 1): U(-1/sqrt(window), 1/sqrt(window))."""
    kw, kb = jax.random.split(key)
    bound = 1.0 / (window ** 0.5)
    weight = jax.random.uniform(kw, (1, window), jnp.float32, -bound, bound)
    bias = jax.random.uniform(kb, (1,), jnp.float32, -bound, bound)
    return weight, bias


if __name__ == "__main__":
    key = jax.random.PRNGKey(0)
    k_x, k_p = jax.random.split(key)

    batch, features, window = 2, 4, 8
    x = jax.random.normal(k_x, (batch, features, window), jnp.float32)
    weight, bias = init_ar_params(window, k_p)

    out = jax.block_until_ready(ar_forward(x, weight, bias))
    ref = x @ weight.reshape(window, 1) + bias.reshape(1, 1)
    assert out.shape == (batch, features, 1), out.shape
    assert jnp.allclose(out, ref, atol=1e-5, rtol=1e-5), "mismatch vs reference"

    # Larger case to exercise the packed multi-tile grid + padding path.
    m_big = 40000
    x_big = jax.random.normal(k_x, (m_big, window), jnp.float32)
    out_big = jax.block_until_ready(ar_forward(x_big, weight, bias))
    ref_big = x_big @ weight.reshape(window, 1) + bias.reshape(1, 1)
    assert out_big.shape == (m_big, 1), out_big.shape
    assert jnp.allclose(out_big, ref_big, atol=1e-5, rtol=1e-5), "mismatch vs reference (big)"

    print("KERNEL_OK")
</pallas_src>

<mosaic_0001>
module attributes {stable_mosaic.version = 11 : i64} {
  func.func @_ar_packed_kernel(%arg0: i32, %arg1: memref<8x128xf32, #tpu.memory_space<vmem>>, %arg2: memref<128x16xf32, #tpu.memory_space<vmem>>, %arg3: memref<1xf32, #tpu.memory_space<smem>>, %arg4: memref<8x16xf32, #tpu.memory_space<vmem>>) attributes {dimension_semantics = [#tpu.dimension_semantics<parallel>], iteration_bounds = array<i64: 1>, scalar_prefetch = 0 : i64, scratch_operands = 0 : i64, tpu.core_type = #tpu.core_type<tc>, window_params = [{transform_indices = @transform_0, window_bounds = array<i64: 8, 128>}, {pipeline_mode = #tpu.pipeline_mode<synchronous>, transform_indices = @transform_1, window_bounds = array<i64: 128, 16>}, {transform_indices = @transform_2, window_bounds = array<i64: 1>}, {transform_indices = @transform_3, window_bounds = array<i64: 8, 16>}]} {
    %c0 = arith.constant 0 : index
    %c0_0 = arith.constant 0 : index
    %0 = vector.load %arg1[%c0, %c0_0] : memref<8x128xf32, #tpu.memory_space<vmem>>, vector<8x128xf32>
    %c0_1 = arith.constant 0 : index
    %c0_2 = arith.constant 0 : index
    %1 = vector.load %arg2[%c0_1, %c0_2] : memref<128x16xf32, #tpu.memory_space<vmem>>, vector<128x16xf32>
    %cst = arith.constant dense<0.000000e+00> : vector<8x16xf32>
    %2 = tpu.matmul %0, %1, %cst {dimension_numbers = #tpu.dot_dimension_numbers<[1], [0], [0], [1], [0, 0, 1, 1], [], []>} : vector<8x128xf32>, vector<128x16xf32>, vector<8x16xf32> -> vector<8x16xf32>
    %c0_3 = arith.constant 0 : index
    %3 = memref.load %arg3[%c0_3] : memref<1xf32, #tpu.memory_space<smem>>
    %4 = vector.broadcast %3 : f32 to vector<8x16xf32>
    %5 = arith.addf %2, %4 : vector<8x16xf32>
    %c0_4 = arith.constant 0 : index
    %c0_5 = arith.constant 0 : index
    %6 = vector.load %arg4[%c0_4, %c0_5] : memref<8x16xf32, #tpu.memory_space<vmem>>, vector<8x16xf32>
    tpu.vector_store %arg4[%c0_4, %c0_5], %5 {strides = array<i32>} : memref<8x16xf32, #tpu.memory_space<vmem>>, vector<8x16xf32>,
    return
  }
  func.func @transform_0(%arg0: i32) -> (i32, i32) {
    %c0_i32 = arith.constant 0 : i32
    %c0_i32_0 = arith.constant 0 : i32
    return %arg0, %c0_i32 : i32, i32
  }
  func.func @transform_1(%arg0: i32) -> (i32, i32) {
    %c0_i32 = arith.constant 0 : i32
    %c0_i32_0 = arith.constant 0 : i32
    %c0_i32_1 = arith.constant 0 : i32
    return %c0_i32, %c0_i32_0 : i32, i32
  }
  func.func @transform_2(%arg0: i32) -> i32 {
    %c0_i32 = arith.constant 0 : i32
    %c0_i32_0 = arith.constant 0 : i32
    return %c0_i32 : i32
  }
  func.func @transform_3(%arg0: i32) -> (i32, i32) {
    %c0_i32 = arith.constant 0 : i32
    %c0_i32_0 = arith.constant 0 : i32
    return %arg0, %c0_i32 : i32, i32
  }
}

</mosaic_0001>

<bundles_post_ra>
// kernel: ar_forward.1
= control target key start
LH: loop header
LB: loop body
LE: loop exit
PB: predicated region body
PF: predicated region fallthrough
CT: control target
= control target key end

     0   :  { %v164_v0 = vmov 0.0   ;;  %vm165_vm0 = vmmov 0   ;;  %vm104_vm1 = vcmask 130048   ;;  %s243_s1 = inlined_call_operand.vmem [shape: f32[128,16], index: 1, kind: input, shape index: {}]   ;;  %s244_s0 = inlined_call_operand.vmem [shape: f32[8,128], index: 0, kind: input, shape index: {}]   ;;  %s245_s2 = inlined_call_operand.<no memory space> [shape: f32[1], index: 2, kind: input, shape index: {}]   ;;  %s246_s3 = inlined_call_operand.vmem [shape: f32[8,16], index: 3, kind: output, shape index: {}]  }
   0x1   :  { %127 = vmatprep.subr.mxu0 %v164_v0  ;;  %v31_v1 = vld [vmem:[%s243_s1 + $0x78] sm:$0xff]  ;;  %v30_v2 = vld [vmem:[%s243_s1 + $0x70] sm:$0xff]  ;;  %159 = vmatprep.mubr.msk.f32.mxu0 %vm165_vm0, %v164_v0  ;;  %v29_v3 = vld [vmem:[%s243_s1 + $0x68] sm:$0xff]  ;;  %v33_v18 = vstv %s245_s2 }
   0x2   :  { %128 = vmatpush3.msra.mxu0 %v31_v1  ;;  %v28_v4 = vld [vmem:[%s243_s1 + $0x60] sm:$0xff]  ;;  %v27_v5 = vld [vmem:[%s243_s1 + $0x58] sm:$0xff]  ;;  %v26_v6 = vld [vmem:[%s243_s1 + $0x50] sm:$0xff] }
   0x3   :  { %129 = vmatprep.subr.mxu0 %v164_v0  ;;  %v25_v7 = vld [vmem:[%s243_s1 + $0x48] sm:$0xff]  ;;  %v24_v8 = vld [vmem:[%s243_s1 + $0x40] sm:$0xff]  ;;  %v23_v9 = vld [vmem:[%s243_s1 + $0x38] sm:$0xff] }
   0x4   :  { %130 = vmatpush3.msra.mxu0 %v30_v2  ;;  %v22_v10 = vld [vmem:[%s243_s1 + $0x30] sm:$0xff]  ;;  %v21_v11 = vld [vmem:[%s243_s1 + $0x28] sm:$0xff]  ;;  %v20_v12 = vld [vmem:[%s243_s1 + $0x20] sm:$0xff] }
   0x5   :  { %131 = vmatprep.subr.mxu0 %v164_v0  ;;  %v19_v13 = vld [vmem:[%s243_s1 + $0x18] sm:$0xff]  ;;  %v18_v14 = vld [vmem:[%s243_s1 + $0x10] sm:$0xff]  ;;  %v17_v15 = vld [vmem:[%s243_s1 + $0x8] sm:$0xff] }
   0x6   :  { %132 = vmatpush3.msra.mxu0 %v29_v3  ;;  %v16_v16 = vld [vmem:[%s243_s1] sm:$0xff] }
   0x7   :  { %133 = vmatprep.subr.mxu0 %v164_v0  ;;  %v15_v17 = vld [vmem:[%s244_s0] sm:$0xff] }
   0x8   :  { %134 = vmatpush3.msra.mxu0 %v28_v4 }
   0x9   :  { %135 = vmatprep.subr.mxu0 %v164_v0 }
   0xa   :  { %136 = vmatpush3.msra.mxu0 %v27_v5 }
   0xb   :  { %137 = vmatprep.subr.mxu0 %v164_v0 }
   0xc   :  { %138 = vmatpush3.msra.mxu0 %v26_v6 }
   0xd   :  { %139 = vmatprep.subr.mxu0 %v164_v0 }
   0xe   :  { %140 = vmatpush3.msra.mxu0 %v25_v7 }
   0xf   :  { %141 = vmatprep.subr.mxu0 %v164_v0 }
  0x10   :  { %142 = vmatpush3.msra.mxu0 %v24_v8 }
  0x11   :  { %143 = vmatprep.subr.mxu0 %v164_v0 }
  0x12   :  { %144 = vmatpush3.msra.mxu0 %v23_v9 }
  0x13   :  { %145 = vmatprep.subr.mxu0 %v164_v0 }
  0x14   :  { %146 = vmatpush3.msra.mxu0 %v22_v10 }
  0x15   :  { %147 = vmatprep.subr.mxu0 %v164_v0 }
  0x16   :  { %148 = vmatpush3.msra.mxu0 %v21_v11 }
  0x17   :  { %149 = vmatprep.subr.mxu0 %v164_v0 }
  0x18   :  { %150 = vmatpush3.msra.mxu0 %v20_v12 }
  0x19   :  { %151 = vmatprep.subr.mxu0 %v164_v0 }
  0x1a   :  { %152 = vmatpush3.msra.mxu0 %v19_v13 }
  0x1b   :  { %153 = vmatprep.subr.mxu0 %v164_v0 }
  0x1c   :  { %154 = vmatpush3.msra.mxu0 %v18_v14 }
  0x1d   :  { %155 = vmatprep.subr.mxu0 %v164_v0 }
  0x1e   :  { %156 = vmatpush3.msra.mxu0 %v17_v15 }
  0x1f   :  { %157 = vmatprep.subr.mxu0 %v164_v0 }
  0x20   :  { %158 = vmatpush3.msra.mxu0 %v16_v16 }
  0x21   :  { %160 = vmatmul.mubr.f32.vlgmr.msra.gmra.mxu0 %v15_v17 }
  0xe1   :  { %v100_v19 = vpop.f32.mrf.mxu0 }
  0xe2   :  { %v101_v20 = vadd.f32 %v100_v19, %v33_v18 }
  0xe3   :  { %v161_v21 = vpop.f32.mrf.mxu0 }
  0xe4   :  { %105 = vst.msk [vmem:[%s246_s3] sm:$0xff] %vm104_vm1, %v101_v20 }

</bundles_post_ra>
